<compile_context>
chip_gen: v7x
topology: tpu7x:2x2x1
jax: 0.10.0
libtpu: 0.0.40
codegen_flags: <defaults>
</compile_context>

<pallas_src>
import functools

import jax
import jax.numpy as jnp
from jax.experimental import pallas as pl
from jax.experimental.pallas import tpu as pltpu


def _lm_criterion_kernel(x_ref, tgt_ref, msk_ref, num_ref, den_ref,
                         num_acc, den_acc, *, total_rows, n_inner, ragged):
    """Processes one (row_tile, V) tile of log-probs.

    x_ref:   (row_tile, V)  log-probs, native dtype (f32 / bf16)
    tgt_ref: (row_tile, 1)  int32 target ids
    msk_ref: (row_tile, 1)  float32 mask
    num_ref: (8, 1) f32     partial sum of gathered*mask for this outer index
    den_ref: (8, 1) f32     partial sum of mask for this outer index
    num_acc / den_acc:      (8, 1) f32 VMEM accumulators
    """
    o = pl.program_id(0)
    i = pl.program_id(1)

    @pl.when(i == 0)
    def _():
        num_acc[...] = jnp.zeros_like(num_acc)
        den_acc[...] = jnp.zeros_like(den_acc)

    x = x_ref[...]                        # (rows, V) native dtype
    tgt = tgt_ref[...]                    # (rows, 1) int32
    msk = msk_ref[...]                    # (rows, 1) f32

    rows, vocab = x.shape
    groups = rows // 8

    # (1, V) iota broadcast against (rows, 1) targets -> (rows, V) one-hot select.
    lane_ids = jax.lax.broadcasted_iota(jnp.int32, (1, vocab), 1)
    sel = lane_ids == tgt                 # (rows, V) bool, <=1 true lane per row

    # Select BEFORE any reduce so garbage lanes never enter the sum; the native-dtype
    # lane reduce is exact because at most one lane per row is nonzero.
    picked = jnp.where(sel, x, jnp.zeros_like(x))                       # (rows, V)
    row_val = jnp.sum(picked, axis=1, keepdims=True).astype(jnp.float32)  # (rows, 1)

    if ragged:
        # Tail rows past R (and whole clamped duplicate tiles) contribute 0.
        # where-SELECT (not multiply) so NaN/Inf garbage in those rows is dropped.
        row0 = (o * n_inner + i) * rows
        row_ids = jax.lax.broadcasted_iota(jnp.int32, (rows, 1), 0) + row0
        valid = row_ids < total_rows
        row_val = jnp.where(valid, row_val, 0.0)
        msk = jnp.where(valid, msk, 0.0)

    contrib = row_val * msk               # (rows, 1) f32

    # Pure sublane-aligned VPU adds into the tiny (8, 1) accumulators.
    num_acc[...] += jnp.sum(contrib.reshape(groups, 8, 1), axis=0)
    den_acc[...] += jnp.sum(msk.reshape(groups, 8, 1), axis=0)

    @pl.when(i == n_inner - 1)
    def _():
        num_ref[...] = num_acc[...]
        den_ref[...] = den_acc[...]


def _num_tensorcores():
    """Best-effort TensorCore-per-chip count; defaults to 1 (always correct)."""
    try:
        info = pltpu.get_tpu_info()
        for attr in ("num_cores", "core_count", "tensorcore_count", "num_tensorcores"):
            v = getattr(info, attr, None)
            if v:
                return int(v)
    except Exception:
        pass
    try:
        v = getattr(jax.devices()[0], "num_cores", None)
        if v:
            return int(v)
    except Exception:
        pass
    return 1


def _vmem_limit_bytes():
    try:
        cap = int(pltpu.get_tpu_info().vmem_capacity_bytes)
    except Exception:
        cap = 64 * 1024 * 1024
    if cap >= 96 * 1024 * 1024:
        # 128-MiB parts (v5e/v6e): don't artificially cap at 64 MiB.
        return int(min(100 * 1024 * 1024, (cap * 3) // 4))
    # 64-MiB parts (v7x): 3/4 of physical.
    return int((cap * 3) // 4)


def _pick_row_tile(n_rows, vocab, itemsize, target_bytes):
    """Row-tile so the x block is ~target_bytes, rounded to the sublane packing."""
    sublane = max(8, 32 // max(1, itemsize))        # 8 f32, 16 bf16, 32 int8
    rt = max(1, target_bytes // max(1, vocab * itemsize))
    rt = max(sublane, (rt // sublane) * sublane)
    rows_rounded = -(-n_rows // sublane) * sublane
    rt = min(rt, max(rows_rounded, sublane))
    return int(rt)


@jax.jit
def language_model_criterion(inp, target, mask):
    """JAX/Pallas equivalent of LanguageModelCriterion.forward."""
    B, T, V = inp.shape
    target = target[:, :T].astype(jnp.int32)
    mask = mask[:, :T].astype(jnp.float32)

    R = B * T
    x2 = inp.reshape(R, V)               # native dtype; no cast, no pad copy
    t2 = target.reshape(R, 1)
    m2 = mask.reshape(R, 1)

    vmem_limit = _vmem_limit_bytes()
    itemsize = jnp.dtype(inp.dtype).itemsize
    # ~8 MiB tiles (double-buffered x stays well under the vmem limit).
    target_bytes = int(min(8 * 1024 * 1024, vmem_limit // 4))
    row_tile = _pick_row_tile(R, V, itemsize, target_bytes)

    n_tiles = -(-R // row_tile)
    n_cores = _num_tensorcores()
    n_outer = n_cores if (n_cores > 1 and n_tiles >= n_cores) else 1
    n_inner = -(-n_tiles // n_outer)
    ragged = (n_outer * n_inner * row_tile) != R

    if ragged:
        def row_map(o, i):
            # Clamp duplicate tail steps to the last real tile; the kernel masks them.
            return (jnp.minimum(o * n_inner + i, n_tiles - 1), 0)
    else:
        def row_map(o, i):
            return (o * n_inner + i, 0)

    kernel = functools.partial(_lm_criterion_kernel, total_rows=R,
                               n_inner=n_inner, ragged=ragged)

    if n_outer > 1:
        # Only CORE_PARALLEL actually shards the outer axis across TensorCores (v7x).
        outer_sem = getattr(pltpu, "CORE_PARALLEL", "parallel")
        dim_sem = (outer_sem, getattr(pltpu, "ARBITRARY", "arbitrary"))
    else:
        dim_sem = ("arbitrary", "arbitrary")

    num_out, den_out = pl.pallas_call(
        kernel,
        out_shape=(jax.ShapeDtypeStruct((n_outer * 8, 1), jnp.float32),
                   jax.ShapeDtypeStruct((n_outer * 8, 1), jnp.float32)),
        grid_spec=pltpu.PrefetchScalarGridSpec(
            num_scalar_prefetch=0,
            grid=(n_outer, n_inner),
            in_specs=[
                pl.BlockSpec((row_tile, V), row_map),
                pl.BlockSpec((row_tile, 1), row_map),
                pl.BlockSpec((row_tile, 1), row_map),
            ],
            out_specs=[
                pl.BlockSpec((8, 1), lambda o, i: (o, 0)),
                pl.BlockSpec((8, 1), lambda o, i: (o, 0)),
            ],
            scratch_shapes=[
                pltpu.VMEM((8, 1), jnp.float32),
                pltpu.VMEM((8, 1), jnp.float32),
            ],
        ),
        compiler_params=pltpu.CompilerParams(
            dimension_semantics=dim_sem,
            vmem_limit_bytes=vmem_limit,
        ),
    )(x2, t2, m2)

    # Tiny epilogue:  loss = sum(-gathered*mask) / sum(mask)
    return -(jnp.sum(num_out) / jnp.sum(den_out))


def _reference(inp, target, mask):
    """Pure-JAX reference matching the PyTorch forward."""
    B, T, V = inp.shape
    tgt = target[:, :T].astype(jnp.int32)
    msk = mask[:, :T].astype(jnp.float32)
    gathered = jnp.take_along_axis(inp.astype(jnp.float32), tgt[..., None], axis=2)[..., 0]
    out = -gathered * msk
    return jnp.sum(out) / jnp.sum(msk)


if __name__ == "__main__":
    key = jax.random.PRNGKey(0)
    k1, k2, k3 = jax.random.split(key, 3)

    B, T, T_tgt, V = 2, 8, 10, 32  # target/mask longer than T to exercise slicing

    logits = jax.random.normal(k1, (B, T, V), dtype=jnp.float32)
    log_probs = jax.nn.log_softmax(logits, axis=-1)          # "input" log-probs
    target = jax.random.randint(k2, (B, T_tgt), 0, V, dtype=jnp.int32)
    mask = (jax.random.uniform(k3, (B, T_tgt)) > 0.2).astype(jnp.float32)
    # Guarantee a non-zero denominator.
    mask = mask.at[0, 0].set(1.0)

    loss = language_model_criterion(log_probs, target, mask)
    loss = jax.block_until_ready(loss)

    ref = _reference(log_probs, target, mask)
    assert jnp.allclose(loss, ref, rtol=1e-5, atol=1e-6), (loss, ref)

    print("KERNEL_OK")
</pallas_src>

<mosaic_0001>
module attributes {stable_mosaic.version = 11 : i64} {
  func.func @_lm_criterion_kernel(%arg0: i32, %arg1: i32, %arg2: memref<16x32xf32, #tpu.memory_space<vmem>>, %arg3: memref<16x1xi32, #tpu.memory_space<vmem>>, %arg4: memref<16x1xf32, #tpu.memory_space<vmem>>, %arg5: memref<8x1xf32, #tpu.memory_space<vmem>>, %arg6: memref<8x1xf32, #tpu.memory_space<vmem>>, %arg7: memref<8x1xf32, #tpu.memory_space<vmem>>, %arg8: memref<8x1xf32, #tpu.memory_space<vmem>>) attributes {dimension_semantics = [#tpu.dimension_semantics<arbitrary>, #tpu.dimension_semantics<arbitrary>], iteration_bounds = array<i64: 1, 1>, scalar_prefetch = 0 : i64, scratch_operands = 2 : i64, tpu.core_type = #tpu.core_type<tc>, window_params = [{transform_indices = @transform_0, window_bounds = array<i64: 16, 32>}, {transform_indices = @transform_1, window_bounds = array<i64: 16, 1>}, {transform_indices = @transform_2, window_bounds = array<i64: 16, 1>}, {transform_indices = @transform_3, window_bounds = array<i64: 8, 1>}, {transform_indices = @transform_4, window_bounds = array<i64: 8, 1>}]} {
    %c0_i32 = arith.constant 0 : i32
    %0 = arith.cmpi eq, %arg1, %c0_i32 : i32
    %1 = arith.extui %0 : i1 to i32
    %c0_i32_0 = arith.constant 0 : i32
    %2 = arith.cmpi ne, %1, %c0_i32_0 : i32
    scf.if %2 {
      %cst_19 = arith.constant 0.000000e+00 : f32
      %28 = vector.broadcast %cst_19 : f32 to vector<8x1xf32>
      %c0_20 = arith.constant 0 : index
      %c0_21 = arith.constant 0 : index
      %29 = vector.load %arg7[%c0_20, %c0_21] : memref<8x1xf32, #tpu.memory_space<vmem>>, vector<8x1xf32>
      tpu.vector_store %arg7[%c0_20, %c0_21], %28 {strides = array<i32>} : memref<8x1xf32, #tpu.memory_space<vmem>>, vector<8x1xf32>,
      %cst_22 = arith.constant 0.000000e+00 : f32
      %30 = vector.broadcast %cst_22 : f32 to vector<8x1xf32>
      %c0_23 = arith.constant 0 : index
      %c0_24 = arith.constant 0 : index
      %31 = vector.load %arg8[%c0_23, %c0_24] : memref<8x1xf32, #tpu.memory_space<vmem>>, vector<8x1xf32>
      tpu.vector_store %arg8[%c0_23, %c0_24], %30 {strides = array<i32>} : memref<8x1xf32, #tpu.memory_space<vmem>>, vector<8x1xf32>,
    } else {
    }
    %c0 = arith.constant 0 : index
    %c0_1 = arith.constant 0 : index
    %3 = vector.load %arg2[%c0, %c0_1] : memref<16x32xf32, #tpu.memory_space<vmem>>, vector<16x32xf32>
    %c0_2 = arith.constant 0 : index
    %c0_3 = arith.constant 0 : index
    %4 = vector.load %arg3[%c0_2, %c0_3] : memref<16x1xi32, #tpu.memory_space<vmem>>, vector<16x1xi32>
    %c0_4 = arith.constant 0 : index
    %c0_5 = arith.constant 0 : index
    %5 = vector.load %arg4[%c0_4, %c0_5] : memref<16x1xf32, #tpu.memory_space<vmem>>, vector<16x1xf32>
    %6 = tpu.iota {dimensions = array<i32: 1>} : vector<1x32xi32>
    %7 = vector.broadcast %6 : vector<1x32xi32> to vector<16x32xi32>
    %8 = vector.broadcast %4 : vector<16x1xi32> to vector<16x32xi32>
    %9 = arith.cmpi eq, %7, %8 : vector<16x32xi32>
    %cst = arith.constant 0.000000e+00 : f32
    %10 = vector.broadcast %cst : f32 to vector<16x32xf32>
    %11 = arith.select %9, %3, %10 : vector<16x32xi1>, vector<16x32xf32>
    %cst_6 = arith.constant dense<0.000000e+00> : vector<16xf32>
    %12 = vector.multi_reduction <add>, %11, %cst_6 [1] : vector<16x32xf32> to vector<16xf32>
    %13 = vector.shape_cast %12 : vector<16xf32> to vector<16x1xf32>
    %14 = arith.mulf %13, %5 : vector<16x1xf32>
    %c0_7 = arith.constant 0 : index
    %c0_8 = arith.constant 0 : index
    %15 = vector.load %arg7[%c0_7, %c0_8] : memref<8x1xf32, #tpu.memory_space<vmem>>, vector<8x1xf32>
    %16 = vector.shape_cast %14 : vector<16x1xf32> to vector<2x8x1xf32>
    %cst_9 = arith.constant dense<0.000000e+00> : vector<8x1xf32>
    %17 = vector.multi_reduction <add>, %16, %cst_9 [0] : vector<2x8x1xf32> to vector<8x1xf32>
    %18 = arith.addf %15, %17 : vector<8x1xf32>
    %c0_10 = arith.constant 0 : index
    %c0_11 = arith.constant 0 : index
    %19 = vector.load %arg7[%c0_10, %c0_11] : memref<8x1xf32, #tpu.memory_space<vmem>>, vector<8x1xf32>
    tpu.vector_store %arg7[%c0_10, %c0_11], %18 {strides = array<i32>} : memref<8x1xf32, #tpu.memory_space<vmem>>, vector<8x1xf32>,
    %c0_12 = arith.constant 0 : index
    %c0_13 = arith.constant 0 : index
    %20 = vector.load %arg8[%c0_12, %c0_13] : memref<8x1xf32, #tpu.memory_space<vmem>>, vector<8x1xf32>
    %21 = vector.shape_cast %5 : vector<16x1xf32> to vector<2x8x1xf32>
    %cst_14 = arith.constant dense<0.000000e+00> : vector<8x1xf32>
    %22 = vector.multi_reduction <add>, %21, %cst_14 [0] : vector<2x8x1xf32> to vector<8x1xf32>
    %23 = arith.addf %20, %22 : vector<8x1xf32>
    %c0_15 = arith.constant 0 : index
    %c0_16 = arith.constant 0 : index
    %24 = vector.load %arg8[%c0_15, %c0_16] : memref<8x1xf32, #tpu.memory_space<vmem>>, vector<8x1xf32>
    tpu.vector_store %arg8[%c0_15, %c0_16], %23 {strides = array<i32>} : memref<8x1xf32, #tpu.memory_space<vmem>>, vector<8x1xf32>,
    %c0_i32_17 = arith.constant 0 : i32
    %25 = arith.cmpi eq, %arg1, %c0_i32_17 : i32
    %26 = arith.extui %25 : i1 to i32
    %c0_i32_18 = arith.constant 0 : i32
    %27 = arith.cmpi ne, %26, %c0_i32_18 : i32
    scf.if %27 {
      %c0_19 = arith.constant 0 : index
      %c0_20 = arith.constant 0 : index
      %28 = vector.load %arg7[%c0_19, %c0_20] : memref<8x1xf32, #tpu.memory_space<vmem>>, vector<8x1xf32>
      %c0_21 = arith.constant 0 : index
      %c0_22 = arith.constant 0 : index
      %29 = vector.load %arg5[%c0_21, %c0_22] : memref<8x1xf32, #tpu.memory_space<vmem>>, vector<8x1xf32>
      tpu.vector_store %arg5[%c0_21, %c0_22], %28 {strides = array<i32>} : memref<8x1xf32, #tpu.memory_space<vmem>>, vector<8x1xf32>,
      %c0_23 = arith.constant 0 : index
      %c0_24 = arith.constant 0 : index
      %30 = vector.load %arg8[%c0_23, %c0_24] : memref<8x1xf32, #tpu.memory_space<vmem>>, vector<8x1xf32>
      %c0_25 = arith.constant 0 : index
      %c0_26 = arith.constant 0 : index
      %31 = vector.load %arg6[%c0_25, %c0_26] : memref<8x1xf32, #tpu.memory_space<vmem>>, vector<8x1xf32>
      tpu.vector_store %arg6[%c0_25, %c0_26], %30 {strides = array<i32>} : memref<8x1xf32, #tpu.memory_space<vmem>>, vector<8x1xf32>,
    } else {
    }
    return
  }
  func.func @transform_0(%arg0: i32, %arg1: i32) -> (i32, i32) {
    %c1_i32 = arith.constant 1 : i32
    %0 = arith.muli %arg0, %c1_i32 : i32
    %1 = arith.addi %0, %arg1 : i32
    %c0_i32 = arith.constant 0 : i32
    %c0_i32_0 = arith.constant 0 : i32
    return %1, %c0_i32 : i32, i32
  }
  func.func @transform_1(%arg0: i32, %arg1: i32) -> (i32, i32) {
    %c1_i32 = arith.constant 1 : i32
    %0 = arith.muli %arg0, %c1_i32 : i32
    %1 = arith.addi %0, %arg1 : i32
    %c0_i32 = arith.constant 0 : i32
    %c0_i32_0 = arith.constant 0 : i32
    return %1, %c0_i32 : i32, i32
  }
  func.func @transform_2(%arg0: i32, %arg1: i32) -> (i32, i32) {
    %c1_i32 = arith.constant 1 : i32
    %0 = arith.muli %arg0, %c1_i32 : i32
    %1 = arith.addi %0, %arg1 : i32
    %c0_i32 = arith.constant 0 : i32
    %c0_i32_0 = arith.constant 0 : i32
    return %1, %c0_i32 : i32, i32
  }
  func.func @transform_3(%arg0: i32, %arg1: i32) -> (i32, i32) {
    %c0_i32 = arith.constant 0 : i32
    %c0_i32_0 = arith.constant 0 : i32
    return %arg0, %c0_i32 : i32, i32
  }
  func.func @transform_4(%arg0: i32, %arg1: i32) -> (i32, i32) {
    %c0_i32 = arith.constant 0 : i32
    %c0_i32_0 = arith.constant 0 : i32
    return %arg0, %c0_i32 : i32, i32
  }
}

</mosaic_0001>

<bundles_post_ra>
// kernel: language_model_criterion.1
= control target key start
LH: loop header
LB: loop body
LE: loop exit
PB: predicated region body
PF: predicated region fallthrough
CT: control target
= control target key end

     0   :  { %v165_v0 = vmov 0   ;;  %v95_v3 = vlaneseq  ;;  %vm107_vm0 = vcmask 261120   ;;  %vm86_vm3 = vcmask 7168   ;;  %s226_s1 = inlined_call_operand.vmem [shape: s32[16,1], index: 1, kind: input, shape index: {}]   ;;  %s227_s0 = inlined_call_operand.vmem [shape: f32[16,32], index: 0, kind: input, shape index: {}]   ;;  %s228_s2 = inlined_call_operand.vmem [shape: f32[16,1], index: 2, kind: input, shape index: {}]   ;;  %s229_s4 = inlined_call_operand.vmem [shape: f32[8,1], index: 4, kind: output, shape index: {1}]   ;;  %s230_s3 = inlined_call_operand.vmem [shape: f32[8,1], index: 3, kind: output, shape index: {0}]  }
   0x1   :  { %164 = vset.pattern.permute.xlu0 %v165_v0  ;;  %v91_v1 = vld [vmem:[%s226_s1] sm:$0xff]  ;;  %v92_v2 = vld [vmem:[%s226_s1 + $0x8] sm:$0xff]  ;;  %v166_v14 = vmov 0.0  }
   0x2   :  { %98 = vperm.xlu0 %164, %v91_v1   ;;  %v96_v4 = vand.u32 127, %v95_v3  ;;  %v89_v5 = vld [vmem:[%s227_s0] sm:$0xff]  ;;  %v90_v9 = vld [vmem:[%s227_s0 + $0x8] sm:$0xff]  ;;  %87 = vst.msk [vmem:[#allocation2] sm:$0xff] %vm86_vm3, %v166_v14  ;;  %88 = vst.msk [vmem:[#allocation3] sm:$0xff] %vm86_vm3, %v166_v14 }
   0x3   :  { %v93_v13 = vld [vmem:[%s228_s2] sm:$0xff]  ;;  %v94_v16 = vld [vmem:[%s228_s2 + $0x8] sm:$0xff] }
   0x4   :  { %v124_v15 = vsel %vm86_vm3, %v93_v13, 0.0  ;;  %v125_v17 = vsel %vm86_vm3, %v94_v16, 0.0 }
   0x5   :  { %v126_v18 = vadd.f32 %v125_v17, %v124_v15 }
   0x6   :  { %101 = vperm.xlu0 %164, %v92_v2  }
   0x9   :  { %v123_v19 = vld [vmem:[#allocation3] sm:$0xff]  ;;  %v116_v27 = vld [vmem:[#allocation2] sm:$0xff] }
   0xa   :  { %v127_v20 = vadd.f32 %v126_v18, %v123_v19 }
   0xc   :  { %128 = vst.msk [vmem:[#allocation3] sm:$0xff] %vm86_vm3, %v127_v20 }
  0x13   :  { %v134_v21 = vld [vmem:[#allocation3] sm:$0xff] }
  0x14   :  { %135 = vst.msk [vmem:[%s229_s4] sm:$0xff] %vm86_vm3, %v134_v21 }
  0x81   :  { %v99_v6 = vpop.permute.xlu0 %98 }
  0x82   :  { %vm103_vm1 = vcmp.eq.s32.totalorder %v96_v4, %v99_v6 }
  0x83   :  { %v105_v7 = vsel %vm103_vm1, %v89_v5, 0.0 }
  0x84   :  { %v108_v8 = vsel %vm107_vm0, %v105_v7, 0.0 }
  0x85   :  { %v102_v10 = vpop.permute.xlu0 %101  ;;  %109 = vadd.xlane.f32.xlu1 %v108_v8 }
  0x86   :  { %vm104_vm2 = vcmp.eq.s32.totalorder %v96_v4, %v102_v10 }
  0x87   :  { %v106_v11 = vsel %vm104_vm2, %v90_v9, 0.0 }
  0x88   :  { %v111_v12 = vsel %vm107_vm0, %v106_v11, 0.0 }
  0x89   :  { %112 = vadd.xlane.f32.xlu1 %v111_v12 }
 0x112   :  { %v110_v22 = vpop.xlane.xlu1 %109 }
 0x113   :  { %v114_v23 = vmul.f32 %v110_v22, %v93_v13 }
 0x115   :  { %v118_v26 = vsel %vm86_vm3, %v114_v23, 0.0 }
 0x116   :  { %v113_v24 = vpop.xlane.xlu1 %112 }
 0x117   :  { %v115_v25 = vmul.f32 %v113_v24, %v94_v16 }
 0x119   :  { %v119_v28 = vsel %vm86_vm3, %v115_v25, 0.0 }
 0x11a   :  { %v120_v29 = vadd.f32 %v119_v28, %v118_v26 }
 0x11c   :  { %v121_v30 = vadd.f32 %v120_v29, %v116_v27 }
 0x11e   :  { %122 = vst.msk [vmem:[#allocation2] sm:$0xff] %vm86_vm3, %v121_v30 }
 0x125   :  { %v132_v31 = vld [vmem:[#allocation2] sm:$0xff] }
 0x126   :  { %133 = vst.msk [vmem:[%s230_s3] sm:$0xff] %vm86_vm3, %v132_v31 }

</bundles_post_ra>
